<compile_context>
chip_gen: v7x
topology: tpu7x:2x2x1
jax: 0.10.0
libtpu: 0.0.40
codegen_flags: <defaults>
</compile_context>

<pallas_src>
import jax
import jax.numpy as jnp
from jax.experimental import pallas as pl
from jax.experimental.pallas import tpu as pltpu


_LANE = 512            # last-dim width: multiple of 128 (vreg lanes) and of 4
_TILE_ROWS = 1024      # 1024 x 512 f32 = 2 MiB per block buffer
_MIN_GRID_STEPS = 8    # keep both v7x TensorCores fed on mid-size inputs
_SMALL_TOTAL = 16 * 1024   # below this element count, pure XLA wins


def _round_up(x, m):
    return ((x + m - 1) // m) * m


def _clip_boxes_jnp(boxes, width, height):
    """Pure-XLA clamp (fast path for tiny inputs, ragged tails, int dtypes)."""
    b = boxes
    b = b.at[..., 0::4].set(jnp.maximum(b[..., 0::4], 0))
    b = b.at[..., 1::4].set(jnp.maximum(b[..., 1::4], 0))
    b = b.at[..., 2::4].set(jnp.minimum(b[..., 2::4], width))
    b = b.at[..., 3::4].set(jnp.minimum(b[..., 3::4], height))
    return b


def _make_clip_kernel(lane, width, height, dtype):
    """Kernel: clamp a (tile_rows, lane) block against per-coordinate bounds.

    Bounds are generated in-kernel from the static W/H via a (1, lane) lane
    iota (compile-time pattern); the VPU has huge slack on this HBM-bound
    kernel, so this is free and removes two pipelined input streams.
    """
    w = float(width)
    h = float(height)

    def kernel(x_ref, o_ref):
        phase = jax.lax.broadcasted_iota(jnp.int32, (1, lane), 1) % 4
        lo = jnp.where(phase < 2, 0.0, -jnp.inf).astype(dtype)
        hi = jnp.where(phase == 2, w,
                       jnp.where(phase == 3, h, jnp.inf)).astype(dtype)
        o_ref[...] = jnp.minimum(jnp.maximum(x_ref[...], lo), hi)

    return kernel


def _clip_slab(slab, width, height, tile_rows):
    """Run the streaming clamp over a lane-dense (rows, lane) slab."""
    rows, lane = slab.shape
    dtype = slab.dtype
    # Sublane granularity depends on dtype packing: f32 -> 8, bf16 -> 16, ...
    sub = 32 // dtype.itemsize
    # Tile: multiple of `sub`, capped so (a) it never exceeds the slab and
    # (b) the parallel grid keeps >= _MIN_GRID_STEPS steps (v7x has 2 TCs).
    tile = min(tile_rows,
               _round_up(pl.cdiv(rows, _MIN_GRID_STEPS), sub),
               _round_up(rows, sub))
    tile = max(sub, tile)
    grid = (pl.cdiv(rows, tile),)   # ragged final block is masked by Pallas

    return pl.pallas_call(
        _make_clip_kernel(lane, width, height, dtype),
        out_shape=jax.ShapeDtypeStruct((rows, lane), dtype),
        grid=grid,
        in_specs=[pl.BlockSpec((tile, lane), lambda i: (i, 0))],
        out_specs=pl.BlockSpec((tile, lane), lambda i: (i, 0)),
        compiler_params=pltpu.CompilerParams(
            dimension_semantics=("parallel",)),
    )(slab)


def clip_boxes(boxes, img, *, lane=_LANE, tile_rows=_TILE_ROWS):
    """Pallas equivalent of ClipBoxes.forward(boxes, img).

    boxes: (B, N, 4K) box coordinates.  img: NCHW; only its static (H, W) are
    used as clamp bounds.  Returns the clipped boxes.
    """
    _, _, height, width = img.shape
    B, N, F = boxes.shape
    assert F % 4 == 0, "last dim of boxes must be a multiple of 4"
    assert lane % 128 == 0 and lane % 4 == 0

    total = B * N * F

    # Fast path: tiny inputs or non-float dtypes -> pure-XLA clamp (the Pallas
    # launch + layout plumbing dominates below a few tens of KiB).
    if total <= _SMALL_TOTAL or not jnp.issubdtype(boxes.dtype, jnp.floating):
        return _clip_boxes_jnp(boxes, width, height)

    flat = boxes.reshape(-1)            # row-major contiguous -> bitcast
    main = (total // lane) * lane
    rows = main // lane

    if main == total:
        # Copy-free path: both reshapes are bitcasts; no pad, no final slice.
        out = _clip_slab(flat.reshape(rows, lane), width, height, tile_rows)
        return out.reshape(B, N, F)

    # Ragged path: lane-aligned head through the kernel; the (< lane)-element
    # tail is clamped with a tiny jnp epilogue.  main % 4 == 0, so the
    # x1,y1,x2,y2 phase is preserved in the tail.
    head = _clip_slab(flat[:main].reshape(rows, lane), width, height, tile_rows)
    tail = _clip_boxes_jnp(flat[main:].reshape(-1, 4), width, height)
    return jnp.concatenate([head.reshape(-1), tail.reshape(-1)]).reshape(B, N, F)

    # TODO(synk): PyTorch mutates `boxes` in place; JAX is functional, so we
    # return new values (callers wanting in-place reuse should donate `boxes`).


def _reference_clip_boxes(boxes, img):
    """Pure-JAX reference matching the PyTorch semantics."""
    _, _, height, width = img.shape
    b = boxes
    b = b.at[:, :, 0::4].set(jnp.maximum(b[:, :, 0::4], 0))
    b = b.at[:, :, 1::4].set(jnp.maximum(b[:, :, 1::4], 0))
    b = b.at[:, :, 2::4].set(jnp.minimum(b[:, :, 2::4], width))
    b = b.at[:, :, 3::4].set(jnp.minimum(b[:, :, 3::4], height))
    return b


if __name__ == "__main__":
    key = jax.random.PRNGKey(0)
    k1, k2, k3, k4 = jax.random.split(key, 4)

    B, C, H, W = 2, 4, 16, 16
    img = jnp.zeros((B, C, H, W), dtype=jnp.float32)

    def _check(boxes):
        out = jax.block_until_ready(clip_boxes(boxes, img))
        ref = _reference_clip_boxes(boxes, img)
        assert out.shape == boxes.shape and out.dtype == boxes.dtype
        assert jnp.allclose(out, ref), (
            f"Pallas ClipBoxes mismatch vs reference for {boxes.shape} {boxes.dtype}")
        return out

    # 1) Module-consistent tiny case (B, 8, 4) -> pure-XLA fast path.
    _check(jax.random.uniform(k1, (B, 8, 4), jnp.float32, -10.0, 30.0))

    # 2) Lane-aligned case (total % 512 == 0) -> copy-free Pallas path,
    #    rows = 64, grid of 8 parallel tiles.
    _check(jax.random.uniform(k2, (B, 4096, 4), jnp.float32, -10.0, 30.0))

    # 3) Ragged case -> Pallas head + tiny jnp tail epilogue + masked edge tile.
    _check(jax.random.uniform(k3, (B, 3000, 4), jnp.float32, -10.0, 30.0))

    # 4) bf16 with a 4K-wide last dim -> Pallas path with 16-row sublane tiles.
    _check(jax.random.uniform(k4, (B, 2048, 8), jnp.float32, -10.0, 30.0)
           .astype(jnp.bfloat16))

    print("KERNEL_OK")
</pallas_src>

<mosaic_0001>
module attributes {stable_mosaic.version = 11 : i64} {
  func.func @kernel(%arg0: i32, %arg1: memref<8x512xf32, #tpu.memory_space<vmem>>, %arg2: memref<8x512xf32, #tpu.memory_space<vmem>>) attributes {dimension_semantics = [#tpu.dimension_semantics<parallel>], iteration_bounds = array<i64: 8>, scalar_prefetch = 0 : i64, scratch_operands = 0 : i64, tpu.core_type = #tpu.core_type<tc>, window_params = [{transform_indices = @transform_0, window_bounds = array<i64: 8, 512>}, {transform_indices = @transform_1, window_bounds = array<i64: 8, 512>}]} {
    %0 = tpu.iota {dimensions = array<i32: 1>} : vector<1x512xi32>
    %c4_i32 = arith.constant 4 : i32
    %c0_i32 = arith.constant 0 : i32
    %1 = arith.cmpi eq, %c4_i32, %c0_i32 : i32
    %c1_i32 = arith.constant 1 : i32
    %2 = arith.select %1, %c1_i32, %c4_i32 : i32
    %3 = vector.broadcast %2 : i32 to vector<1x512xi32>
    %4 = arith.remsi %0, %3 : vector<1x512xi32>
    %c0_i32_0 = arith.constant 0 : i32
    %5 = vector.broadcast %c0_i32_0 : i32 to vector<1x512xi32>
    %6 = arith.cmpi ne, %4, %5 : vector<1x512xi32>
    %c0_i32_1 = arith.constant 0 : i32
    %7 = vector.broadcast %c0_i32_1 : i32 to vector<1x512xi32>
    %8 = arith.cmpi slt, %4, %7 : vector<1x512xi32>
    %c0_i32_2 = arith.constant 0 : i32
    %9 = arith.cmpi slt, %2, %c0_i32_2 : i32
    %10 = vector.broadcast %9 : i1 to vector<1x512xi1>
    %11 = vector.broadcast %10 : vector<1x512xi1> to vector<1x512xi1>
    %12 = arith.xori %8, %11 : vector<1x512xi1>
    %13 = arith.andi %12, %6 : vector<1x512xi1>
    %14 = vector.broadcast %2 : i32 to vector<1x512xi32>
    %15 = arith.addi %4, %14 : vector<1x512xi32>
    %16 = arith.select %13, %15, %4 : vector<1x512xi1>, vector<1x512xi32>
    %c2_i32 = arith.constant 2 : i32
    %17 = vector.broadcast %c2_i32 : i32 to vector<1x512xi32>
    %18 = arith.cmpi slt, %16, %17 : vector<1x512xi32>
    %cst = arith.constant 0.000000e+00 : f32
    %cst_3 = arith.constant 0xFF800000 : f32
    %19 = vector.broadcast %cst : f32 to vector<1x512xf32>
    %20 = vector.broadcast %cst_3 : f32 to vector<1x512xf32>
    %21 = arith.select %18, %19, %20 : vector<1x512xi1>, vector<1x512xf32>
    %c2_i32_4 = arith.constant 2 : i32
    %22 = vector.broadcast %c2_i32_4 : i32 to vector<1x512xi32>
    %23 = arith.cmpi eq, %16, %22 : vector<1x512xi32>
    %c3_i32 = arith.constant 3 : i32
    %24 = vector.broadcast %c3_i32 : i32 to vector<1x512xi32>
    %25 = arith.cmpi eq, %16, %24 : vector<1x512xi32>
    %cst_5 = arith.constant 1.600000e+01 : f32
    %cst_6 = arith.constant 0x7F800000 : f32
    %26 = vector.broadcast %cst_5 : f32 to vector<1x512xf32>
    %27 = vector.broadcast %cst_6 : f32 to vector<1x512xf32>
    %28 = arith.select %25, %26, %27 : vector<1x512xi1>, vector<1x512xf32>
    %cst_7 = arith.constant 1.600000e+01 : f32
    %29 = vector.broadcast %cst_7 : f32 to vector<1x512xf32>
    %30 = arith.select %23, %29, %28 : vector<1x512xi1>, vector<1x512xf32>
    %c0 = arith.constant 0 : index
    %c0_8 = arith.constant 0 : index
    %31 = vector.load %arg1[%c0, %c0_8] : memref<8x512xf32, #tpu.memory_space<vmem>>, vector<8x512xf32>
    %32 = vector.broadcast %21 : vector<1x512xf32> to vector<8x512xf32>
    %33 = arith.maximumf %31, %32 : vector<8x512xf32>
    %34 = vector.broadcast %30 : vector<1x512xf32> to vector<8x512xf32>
    %35 = arith.minimumf %33, %34 : vector<8x512xf32>
    %c0_9 = arith.constant 0 : index
    %c0_10 = arith.constant 0 : index
    %36 = vector.load %arg2[%c0_9, %c0_10] : memref<8x512xf32, #tpu.memory_space<vmem>>, vector<8x512xf32>
    tpu.vector_store %arg2[%c0_9, %c0_10], %35 {strides = array<i32>} : memref<8x512xf32, #tpu.memory_space<vmem>>, vector<8x512xf32>,
    return
  }
  func.func @transform_0(%arg0: i32) -> (i32, i32) {
    %c0_i32 = arith.constant 0 : i32
    %c0_i32_0 = arith.constant 0 : i32
    return %arg0, %c0_i32 : i32, i32
  }
  func.func @transform_1(%arg0: i32) -> (i32, i32) {
    %c0_i32 = arith.constant 0 : i32
    %c0_i32_0 = arith.constant 0 : i32
    return %arg0, %c0_i32 : i32, i32
  }
}

</mosaic_0001>

<bundles_post_ra>
// kernel: tpu_custom_call.1
= control target key start
LH: loop header
LB: loop body
LE: loop exit
PB: predicated region body
PF: predicated region fallthrough
CT: control target
= control target key end

     0   :  { %6 = vsyncpa [#allocation3], 0  ;;  %s656_s0 = inlined_call_operand.hbm [shape: f32[64,512], index: 0, kind: input, shape index: {}]   ;;  %s657_s1 = inlined_call_operand.hbm [shape: f32[64,512], index: 1, kind: output, shape index: {}]  }
   0x1   :  { %8 = vsyncpa [#allocation3 + $0x1], 0 }
   0x2   :  { %9 = vsyncpa [#allocation4], 0 }
   0x3   :  { %11 = vsyncpa [#allocation4 + $0x1], 0  ;;  %s487_s6 = smov 0   ;;  %s489_s7 = smov 0  }
   0x4   :  { %s491_s8 = smov 0   ;;  %s493_s9 = smov 0  }
   0x5 LB: > { %s508_s10 = sadd.s32 4294967295, %s471_s9   ;;  %s311_s11 = sadd.s32 4294967294, %s471_s9   ;;  %s471_s9 = sphi %s493_s9, %s671_s9   ;;  %s467_s8 = sphi %s491_s8, %s670_s8   ;;  %s463_s7 = sphi %s489_s7, %s669_s7   ;;  %s459_s6 = sphi %s487_s6, %s668_s6  }
   0x6   : > { %s512_s12 = sadd.s32 1, %s471_s9   ;;  %s24_s13 = sadd.s32 1, %s467_s8 }
   0x7   : > { %s21_s14 = ssub.s32 %s471_s9, %s512_s12  ;;  %p31_p0 = scmp.ne.s32.totalorder %s467_s8, %s463_s7 }
   0x8   : > { %p22_p1 = scmp.eq.s32.totalorder %s21_s14, 0  ;;  %p32_p2 = scmp.eq.s32.totalorder %s471_s9, 0 }
   0x9   : > { %p37_p3 = scmp.ne.s32.totalorder %s463_s7, %s459_s6  ;;  %p38_p4 = scmp.eq.s32.totalorder %s508_s10, 0 }
   0xa   : > { %s524_s15 = scalar_select %p22_p1, %s467_s8, %s24_s13  }
   0xb   : > { %p526_p5 = por %p32_p2, %p31_p0  ;;  %p530_p6 = por %p38_p4, %p37_p3 }
   0xc   : > { %p61_p7 = scmp.eq.s32.totalorder %s508_s10, 7  ;;  %p67_p8 = scmp.eq.s32.totalorder %s311_s11, 7 }
   0xd   : > { %p339_p9 = scmp.lt.s32.totalorder %s471_s9, 8  ;;  %s87_s20 = sand.u32 1, %s467_s8  }
   0xe   : > { %p536_p10 = por %p61_p7, %p31_p0  ;;  %p540_p11 = por %p67_p8, %p37_p3 }
   0xf   : > { %s325_s21 = sshll.u32 %s471_s9, 9  ;;  %s314_s22 = sshll.u32 %s87_s20, 5 }
  0x10   : > { %s661_s18 = scalar_select %p536_p10, 1, 0 }
  0x11   : > { %s662_s19 = scalar_select %p540_p11, 1, 0 }
  0x12   : > { %s549_s25 = scalar_lea.hbm %s656_s0, %s325_s21  ;;  %s91_s26 = scalar_lea.vmem [#allocation2], %s314_s22 }
  0x13   : > { %s99_s27 = sshll.u32 %s91_s26, 4  ;;  %p553_p12 = pnand %p339_p9, %p526_p5  ;;  %s557_s27 = int_to_ptr.vmem [resolvable:$true] %s99_s27 }
  0x14   : > { %s88_s29 = scalar_lea.sflag [#allocation3], %s87_s20  ;;  %s375_s30 = scalar_lea.hbm %s549_s25, 512 }
  0x15   : > { %p376_p1 = scmp.ne.s32.totalorder %s549_s25, %s375_s30  ;;  %p377_p2 = pneg %p553_p12 }
  0x16   : > { %s380_s4 = scalar_lea.hbm %s656_s0, 4096  ;;  %p381_p5 = scmp.lt.u32.totalorder %s549_s25, %s656_s0 }
  0x17   : > { %p378_p3 = pnand %p377_p2, %p376_p1  ;;  %p382_p7 = scmp.lt.u32.totalorder %s380_s4, %s375_s30 }
  0x18   : > { %p384_p9 = scmp.lt.u32.totalorder %s375_s30, %s549_s25 }
  0x19   : > { %p379_p4 = pneg %p378_p3  ;;  %p383_p8 = por %p382_p7, %p381_p5 }
  0x1b   : > { %p385_p13 = por %p384_p9, %p383_p8 }
  0x1d   : > { %p386_p0 = pnand %p385_p13, %p379_p4 }
  0x1f   : > { %389 = shalt.err (!%p386_p0)
}
  0x20   : > { %s390_s13 = scalar_lea.vmem %s557_s27, 512  ;;  %s473_s14 = smov [#allocation2]  }
  0x21   : > { %p391_p1 = scmp.ne.s32.totalorder %s557_s27, %s390_s13  ;;  %s395_s16 = sshll.u32 %s473_s14, 4  ;;  %s396_s16 = int_to_ptr.vmem [resolvable:$false] %s395_s16 }
  0x22   : > { %s397_s20 = scalar_lea.vmem %s396_s16, 1024  ;;  %p398_p10 = scmp.lt.s32.totalorder %s557_s27, %s396_s16 }
  0x23   : > { %p393_p3 = pnand %p391_p1, %p377_p2  ;;  %p399_p5 = scmp.lt.s32.totalorder %s397_s20, %s390_s13 }
  0x25   : > { %p394_p11 = pneg %p393_p3  ;;  %p400_p7 = por %p399_p5, %p398_p10 }
  0x27   : > { %p401_p8 = pnand %p400_p7, %p394_p11 }
  0x29   : > { %404 = shalt.err (!%p401_p8)
}
  0x2a   : > { %334 = dma.hbm_to_vmem [thread:$0]  (!%p553_p12), %s549_s25, 512, %s557_s27, %s88_s29  }
  0x2b   : > { %p664_p13 = scmp.lt.s32.totalorder %s471_s9, 9  ;;  %p665_p0 = scmp.ge.s32.totalorder %s471_s9, 1 }
  0x2d   : > { %p105_p2 = pnand %p665_p0, %p664_p13 }
  0x2e   : > { %s591_s21 = sand.u32 (!%p105_p2), 1, %s463_s7  }
  0x2f   : > { %108 = sbr.rel (%p105_p2) target bundleno = 87 (0x57), region = 24  ;;  %s318_s22 = sshll.u32 (!%p105_p2), %s591_s21, 5 }
  0x30   : > { %s111_s23 = scalar_lea.sflag (!%p105_p2), [#allocation3], %s591_s21  ;;  %s597_s24 = scalar_lea.vmem (!%p105_p2), [#allocation2], %s318_s22 }
  0x36   : > { %450 = dma.done.wait (%p530_p6), %s111_s23, 512  }
  0x37   : > { %452 = vsyncadd (%p530_p6), %s111_s23, 4294966784  ;;  %v133_v0 = vlaneseq  ;;  %v474_v6 = vmov -inf   ;;  %v475_v8 = vmov inf   ;;  %v210_v10 = vld [vmem:[%s597_s24] sm:$0xff]  ;;  %v211_v11 = vld [vmem:[%s597_s24 + $0x8] sm:$0xff]  ;;  %s132_s17 = scalar_lea.vmem [#allocation5], %s318_s22 }
  0x38   : > { %v212_v16 = vld [vmem:[%s597_s24 + $0x10] sm:$0xff]  ;;  %v213_v27 = vld [vmem:[%s597_s24 + $0x18] sm:$0xff]  ;;  %s241_s25 = sshll.u32 %s132_s17, 4  ;;  %s326_s26 = sshll.u32 %s508_s10, 9  ;;  %s610_s25 = int_to_ptr.vmem [resolvable:$true] %s241_s25 }
  0x39   : > { %v134_v1 = vand.u32 127, %v133_v0  ;;  %s615_s29 = scalar_lea.hbm %s657_s1, %s326_s26  ;;  %s227_s30 = scalar_lea.sflag [#allocation4], %s591_s21 }
  0x3a   : > { %s405_s2 = scalar_lea.vmem %s610_s25, 512  ;;  %p666_p10 = scmp.ne.s32.totalorder %s661_s18, 0 }
  0x3b   : > { %v142_v2 = vand.u32 3, %v134_v1  ;;  %v135_v3 = vadd.s32 128, %v134_v1  ;;  %v136_v4 = vadd.s32 256, %v134_v1  ;;  %v137_v13 = vadd.s32 384, %v134_v1  ;;  %p406_p6 = scmp.ne.s32.totalorder %s610_s25, %s405_s2  ;;  %s476_s10 = smov [#allocation5]  }
  0x3c   : > { %s409_s3 = sshll.u32 %s476_s10, 4  ;;  %s410_s3 = int_to_ptr.vmem [resolvable:$false] %s409_s3 }
  0x3d   : > { %vm186_vm0 = vcmp.lt.s32.totalorder %v142_v2, 2  ;;  %vm194_vm1 = vcmp.eq.s32.totalorder %v142_v2, 2  ;;  %vm198_vm2 = vcmp.eq.s32.totalorder %v142_v2, 3  ;;  %v149_v5 = vand.u32 3, %v135_v3  ;;  %p407_p11 = pnand %p406_p6, %p666_p10  ;;  %s411_s4 = scalar_lea.vmem %s410_s3, 1024 }
  0x3e   : > { %v190_v7 = vsel %vm186_vm0, 0.0, %v474_v6  ;;  %v202_v9 = vsel %vm198_vm2, 16.0, %v475_v8  ;;  %v156_v12 = vand.u32 3, %v136_v4  ;;  %v163_v24 = vand.u32 3, %v137_v13  ;;  %p412_p4 = scmp.lt.s32.totalorder %s610_s25, %s410_s3  ;;  %p413_p9 = scmp.lt.s32.totalorder %s411_s4, %s405_s2 }
  0x3f   : > { %v206_v14 = vsel %vm194_vm1, 16.0, %v202_v9  ;;  %v214_v15 = vmax.f32 %v210_v10, %v190_v7  ;;  %vm187_vm3 = vcmp.lt.s32.totalorder %v149_v5, 2  ;;  %vm195_vm4 = vcmp.eq.s32.totalorder %v149_v5, 2  ;;  %p408_p12 = pneg %p407_p11 }
  0x40   : > { %v191_v17 = vsel %vm187_vm3, 0.0, %v474_v6  ;;  %vm199_vm5 = vcmp.eq.s32.totalorder %v149_v5, 3  ;;  %vm188_vm6 = vcmp.lt.s32.totalorder %v156_v12, 2  ;;  %vm196_vm7 = vcmp.eq.s32.totalorder %v156_v12, 2  ;;  %p414_p1 = por %p413_p9, %p412_p4 }
  0x41   : > { %v218_v18 = vmin.f32 %v214_v15, %v206_v14  ;;  %v203_v19 = vsel %vm199_vm5, 16.0, %v475_v8  ;;  %v215_v20 = vmax.f32 %v211_v11, %v191_v17  ;;  %v192_v21 = vsel %vm188_vm6, 0.0, %v474_v6 }
  0x42   : > { %v207_v22 = vsel %vm195_vm4, 16.0, %v203_v19  ;;  %vm200_vm8 = vcmp.eq.s32.totalorder %v156_v12, 3  ;;  %v216_v23 = vmax.f32 %v212_v16, %v192_v21  ;;  %vm189_vm9 = vcmp.lt.s32.totalorder %v163_v24, 2  ;;  %p415_p3 = pnand %p414_p1, %p408_p12 }
  0x43   : > { %222 = vst [vmem:[%s132_s17] sm:$0xff] %v218_v18  ;;  %v219_v25 = vmin.f32 %v215_v20, %v207_v22  ;;  %v204_v26 = vsel %vm200_vm8, 16.0, %v475_v8  ;;  %vm197_vm10 = vcmp.eq.s32.totalorder %v163_v24, 2  ;;  %vm201_vm11 = vcmp.eq.s32.totalorder %v163_v24, 3 }
  0x44   : > { %v208_v28 = vsel %vm196_vm7, 16.0, %v204_v26  ;;  %v193_v30 = vsel %vm189_vm9, 0.0, %v474_v6  ;;  %v205_v31 = vsel %vm201_vm11, 16.0, %v475_v8 }
  0x45   : > { %223 = vst [vmem:[%s132_s17 + $0x8] sm:$0xff] %v219_v25  ;;  %v220_v29 = vmin.f32 %v216_v23, %v208_v28  ;;  %v209_v32 = vsel %vm197_vm10, 16.0, %v205_v31  ;;  %v217_v33 = vmax.f32 %v213_v27, %v193_v30 }
  0x47   : > { %224 = vst [vmem:[%s132_s17 + $0x10] sm:$0xff] %v220_v29  ;;  %v221_v34 = vmin.f32 %v217_v33, %v209_v32 }
  0x49   : > { %225 = vst [vmem:[%s132_s17 + $0x18] sm:$0xff] %v221_v34 }
  0x4a   : > { %418 = shalt.err (!%p415_p3)
}
  0x4b   : > { %s419_s5 = scalar_lea.hbm %s615_s29, 512  ;;  %s423_s14 = scalar_lea.hbm %s657_s1, 4096 }
  0x4c   : > { %p420_p5 = scmp.ne.s32.totalorder %s615_s29, %s419_s5  ;;  %p424_p13 = scmp.lt.u32.totalorder %s615_s29, %s657_s1 }
  0x4d   : > { %p425_p0 = scmp.lt.u32.totalorder %s423_s14, %s419_s5  ;;  %p427_p6 = scmp.lt.u32.totalorder %s419_s5, %s615_s29 }
  0x4e   : > { %p421_p7 = pnand %p420_p5, %p666_p10 }
  0x4f   : > { %p426_p2 = por %p425_p0, %p424_p13 }
  0x50   : > { %p422_p8 = pneg %p421_p7 }
  0x51   : > { %p428_p11 = por %p427_p6, %p426_p2 }
  0x53   : > { %p429_p12 = pnand %p428_p11, %p422_p8 }
  0x55   : > { %432 = shalt.err (!%p429_p12)
}
  0x56   : > { %329 = dma.vmem_to_hbm [thread:$0]  (%p666_p10), %s610_s25, 512, %s615_s29, %s227_s30  }
  0x57 PF: > { %p340_p4 = scmp.ge.s32.totalorder %s471_s9, 2  ;;  %s253_s21 = sand.u32 1, %s459_s6  }
  0x58   : > { %p667_p9 = scmp.ne.s32.totalorder %s662_s19, 0  ;;  %s254_s22 = scalar_lea.sflag [#allocation4], %s253_s21 }
  0x5a   : > { %p336_p1 = pnand %p340_p4, %p667_p9 }
  0x5c   : > { %454 = dma.done.wait (!%p336_p1), %s254_s22, 512  }
  0x5d   : > { %456 = vsyncadd (!%p336_p1), %s254_s22, 4294966784  ;;  %p14_p3 = scmp.ge.s32.totalorder %s512_s12, 10   ;;  %s668_s6 = smov %s463_s7 }
  0x5e   : > { %s669_s7 = smov %s467_s8  ;;  %s670_s8 = smov %s524_s15 }
  0x5f   : > { %s671_s9 = smov %s512_s12  ;;  %16 = sbr.rel (!%p14_p3) target bundleno = 5 (0x5), region = 69 }
  0x66   :  { %259 = vsyncpa [#allocation3], 1 }
  0x67   :  { %261 = vsyncpa [#allocation3 + $0x1], 1 }
  0x68   :  { %262 = vsyncpa [#allocation4], 1 }
  0x69   :  { %264 = vsyncpa [#allocation4 + $0x1], 1 }

</bundles_post_ra>
